<compile_context>
chip_gen: v7x
topology: tpu7x:2x2x1
jax: 0.10.0
libtpu: 0.0.40
codegen_flags: <defaults>
</compile_context>

<pallas_src>
import jax
import jax.numpy as jnp
from jax.experimental import pallas as pl
from jax.experimental.pallas import tpu as pltpu

_LANE = 128
_SUBLANE = 8
_BLOCK_BYTES = 2 * 1024 * 1024   # per-grid-step x-tile VMEM budget


def _round_up(v, m):
    return (v + m - 1) // m * m


def _ss_scalar_kernel(s_ref, b_ref, x_ref, o_ref):
    # s_ref / b_ref: (1, 1) f32 in SMEM; x_ref / o_ref: (tile_n, F) in VMEM.
    s = s_ref[0, 0]
    b = b_ref[0, 0]
    x = x_ref[...].astype(jnp.float32)
    o_ref[...] = (x * s + b).astype(o_ref.dtype)


def _ss_rowwise_kernel(s_ref, b_ref, x_ref, o_ref):
    # s_ref / b_ref: (tile_n, 1) f32 in VMEM; x_ref / o_ref: (tile_n, F).
    s = s_ref[...]
    b = b_ref[...]
    x = x_ref[...].astype(jnp.float32)
    o_ref[...] = (s * x + b).astype(o_ref.dtype)


def _choose_tile_n(n_rows, n_feat, itemsize):
    """Row tile: ~2 MiB of VMEM per x block, dtype-aligned, >= 2 grid blocks."""
    sub = _SUBLANE * max(1, 4 // itemsize)          # 8 f32 / 16 bf16 / 32 i8
    row_vmem = _round_up(max(n_feat, 1), _LANE) * itemsize   # VMEM lane-pads to 128
    tile = max(sub, (_BLOCK_BYTES // row_vmem) // sub * sub)
    if n_rows > sub:                                # keep >= 2 blocks for v7x megacore
        tile = min(tile, _round_up(pl.cdiv(n_rows, 2), sub))
    tile = min(tile, _round_up(n_rows, sub))        # never exceed (rounded) N
    return max(sub, tile)


def scale_shift_block(x, head, scale, shift):
    """out = atleast_1d(scale)[head] * x + atleast_1d(shift)[head] (per row)."""
    x = jnp.asarray(x)
    orig_ndim = x.ndim
    x2d = x[:, None] if orig_ndim == 1 else x
    N, F = x2d.shape
    head = jnp.asarray(head, dtype=jnp.int32)

    # Keep the (tiny) scale/shift tables in f32 so the f32 FMA sees full precision.
    scale_tbl = jnp.atleast_1d(jnp.asarray(scale, dtype=jnp.float32))
    shift_tbl = jnp.atleast_1d(jnp.asarray(shift, dtype=jnp.float32))

    tile_n = _choose_tile_n(N, F, jnp.dtype(x2d.dtype).itemsize)
    grid = (pl.cdiv(N, tile_n),)
    x_spec = pl.BlockSpec((tile_n, F), lambda i: (i, 0))
    o_spec = pl.BlockSpec((tile_n, F), lambda i: (i, 0))
    params = pltpu.CompilerParams(dimension_semantics=("parallel",))

    if scale_tbl.size == 1 and shift_tbl.size == 1:
        # Module default: scalar scale/shift.  head can only legally index 0,
        # so it is ignored (PyTorch would raise on out-of-range; we do not).
        s11 = scale_tbl.reshape(1, 1)
        b11 = shift_tbl.reshape(1, 1)
        out = pl.pallas_call(
            _ss_scalar_kernel,
            out_shape=jax.ShapeDtypeStruct((N, F), x2d.dtype),
            grid=grid,
            in_specs=[
                pl.BlockSpec(memory_space=pltpu.MemorySpace.SMEM),
                pl.BlockSpec(memory_space=pltpu.MemorySpace.SMEM),
                x_spec,
            ],
            out_specs=o_spec,
            compiler_params=params,
        )(s11, b11, x2d)
    else:
        # Multi-head tables: gather once in the wrapper (two tiny XLA takes)
        # and stream the per-row f32 scale/shift alongside x.
        # NOTE: out-of-range head indices clamp instead of raising.
        s = jnp.take(scale_tbl, head, axis=0).reshape(N, 1)
        b = jnp.take(shift_tbl, head, axis=0).reshape(N, 1)
        sb_spec = pl.BlockSpec((tile_n, 1), lambda i: (i, 0))
        out = pl.pallas_call(
            _ss_rowwise_kernel,
            out_shape=jax.ShapeDtypeStruct((N, F), x2d.dtype),
            grid=grid,
            in_specs=[sb_spec, pl.BlockSpec((tile_n, 1), lambda i: (i, 0)), x_spec],
            out_specs=o_spec,
            compiler_params=params,
        )(s, b, x2d)

    return out[:, 0] if orig_ndim == 1 else out


def _reference(x, head, scale, shift):
    x = jnp.asarray(x)
    s = jnp.atleast_1d(jnp.asarray(scale, dtype=jnp.float32))[head]
    b = jnp.atleast_1d(jnp.asarray(shift, dtype=jnp.float32))[head]
    if x.ndim == 2:
        s, b = s[:, None], b[:, None]
    return (s * x.astype(jnp.float32) + b).astype(x.dtype)


if __name__ == "__main__":
    key = jax.random.PRNGKey(0)
    k1, k2, k3, kh = jax.random.split(key, 4)

    # Case 1: the actual module config — scalar scale/shift, 1-D node energies.
    N = 16
    x1 = jax.random.normal(k1, (N,), dtype=jnp.float32)
    head1 = jnp.zeros((N,), dtype=jnp.int32)
    out1 = jax.block_until_ready(scale_shift_block(x1, head1, 2.0, 0.5))
    ref1 = _reference(x1, head1, 2.0, 0.5)
    assert out1.shape == x1.shape and out1.dtype == x1.dtype
    assert jnp.allclose(out1, ref1, atol=1e-6, rtol=1e-6)

    # Case 2: multi-head scale/shift tables, 2-D features, random heads.
    F, H = 8, 3
    scale_v = jnp.asarray([1.5, -0.25, 3.0], dtype=jnp.float32)
    shift_v = jnp.asarray([0.1, 0.2, -0.3], dtype=jnp.float32)
    x2 = jax.random.normal(k2, (N, F), dtype=jnp.float32)
    head2 = jax.random.randint(kh, (N,), 0, H, dtype=jnp.int32)
    out2 = jax.block_until_ready(scale_shift_block(x2, head2, scale_v, shift_v))
    ref2 = _reference(x2, head2, scale_v, shift_v)
    assert jnp.allclose(out2, ref2, atol=1e-6, rtol=1e-6)

    # Case 3: bf16 activations, scalar scale/shift (FMA in f32, cast on store).
    x3 = jax.random.normal(k3, (N, F), dtype=jnp.bfloat16)
    head3 = jnp.zeros((N,), dtype=jnp.int32)
    out3 = jax.block_until_ready(scale_shift_block(x3, head3, 1.25, -0.75))
    ref3 = _reference(x3, head3, 1.25, -0.75)
    assert out3.dtype == jnp.bfloat16
    assert jnp.allclose(out3.astype(jnp.float32), ref3.astype(jnp.float32),
                        atol=2e-2, rtol=2e-2)

    print("KERNEL_OK")
</pallas_src>

<mosaic_0001>
module attributes {stable_mosaic.version = 11 : i64} {
  func.func @_ss_scalar_kernel(%arg0: i32, %arg1: memref<1x1xf32, #tpu.memory_space<smem>>, %arg2: memref<1x1xf32, #tpu.memory_space<smem>>, %arg3: memref<8x1xf32, #tpu.memory_space<vmem>>, %arg4: memref<8x1xf32, #tpu.memory_space<vmem>>) attributes {dimension_semantics = [#tpu.dimension_semantics<parallel>], iteration_bounds = array<i64: 2>, scalar_prefetch = 0 : i64, scratch_operands = 0 : i64, tpu.core_type = #tpu.core_type<tc>, window_params = [{transform_indices = @transform_0, window_bounds = array<i64: 1, 1>}, {transform_indices = @transform_1, window_bounds = array<i64: 1, 1>}, {transform_indices = @transform_2, window_bounds = array<i64: 8, 1>}, {transform_indices = @transform_3, window_bounds = array<i64: 8, 1>}]} {
    %c0 = arith.constant 0 : index
    %c0_0 = arith.constant 0 : index
    %0 = memref.load %arg1[%c0, %c0_0] : memref<1x1xf32, #tpu.memory_space<smem>>
    %c0_1 = arith.constant 0 : index
    %c0_2 = arith.constant 0 : index
    %1 = memref.load %arg2[%c0_1, %c0_2] : memref<1x1xf32, #tpu.memory_space<smem>>
    %c0_3 = arith.constant 0 : index
    %c0_4 = arith.constant 0 : index
    %2 = vector.load %arg3[%c0_3, %c0_4] : memref<8x1xf32, #tpu.memory_space<vmem>>, vector<8x1xf32>
    %3 = vector.broadcast %0 : f32 to vector<8x1xf32>
    %4 = arith.mulf %2, %3 : vector<8x1xf32>
    %5 = vector.broadcast %1 : f32 to vector<8x1xf32>
    %6 = arith.addf %4, %5 : vector<8x1xf32>
    %c0_5 = arith.constant 0 : index
    %c0_6 = arith.constant 0 : index
    %7 = vector.load %arg4[%c0_5, %c0_6] : memref<8x1xf32, #tpu.memory_space<vmem>>, vector<8x1xf32>
    tpu.vector_store %arg4[%c0_5, %c0_6], %6 {strides = array<i32>} : memref<8x1xf32, #tpu.memory_space<vmem>>, vector<8x1xf32>,
    return
  }
  func.func @transform_0(%arg0: i32) -> (i32, i32) {
    %c0_i32 = arith.constant 0 : i32
    %c0_i32_0 = arith.constant 0 : i32
    %c0_i32_1 = arith.constant 0 : i32
    return %c0_i32, %c0_i32_0 : i32, i32
  }
  func.func @transform_1(%arg0: i32) -> (i32, i32) {
    %c0_i32 = arith.constant 0 : i32
    %c0_i32_0 = arith.constant 0 : i32
    %c0_i32_1 = arith.constant 0 : i32
    return %c0_i32, %c0_i32_0 : i32, i32
  }
  func.func @transform_2(%arg0: i32) -> (i32, i32) {
    %c0_i32 = arith.constant 0 : i32
    %c0_i32_0 = arith.constant 0 : i32
    return %arg0, %c0_i32 : i32, i32
  }
  func.func @transform_3(%arg0: i32) -> (i32, i32) {
    %c0_i32 = arith.constant 0 : i32
    %c0_i32_0 = arith.constant 0 : i32
    return %arg0, %c0_i32 : i32, i32
  }
}

</mosaic_0001>

<bundles_post_ra>
// kernel: tpu_custom_call.1
= control target key start
LH: loop header
LB: loop body
LE: loop exit
PB: predicated region body
PF: predicated region fallthrough
CT: control target
= control target key end

     0   :  { %s251_s16 = smov 0   ;;  %s287_s0 = inlined_call_operand.<no memory space> [shape: f32[1,1], index: 0, kind: input, shape index: {}]   ;;  %s288_s1 = inlined_call_operand.<no memory space> [shape: f32[1,1], index: 1, kind: input, shape index: {}]   ;;  %s289_s2 = inlined_call_operand.vmem [shape: f32[16,1], index: 2, kind: input, shape index: {}]   ;;  %s290_s3 = inlined_call_operand.vmem [shape: f32[16,1], index: 3, kind: output, shape index: {}]  }
   0x1   :  { %8 = sst [smem:[#allocation2]] %s287_s0 }
   0x2   :  { %9 = sst [smem:[#allocation3]] %s288_s1 }
   0x3 LB: > { %s230_s17 = sadd.s32 4294967295, %s253_s16   ;;  %p234_p0 = scmp.ge.s32.totalorder %s253_s16, 1  ;;  %s253_s16 = sphi %s251_s16, %s15_s16  }
   0x4   : > { %p138_p1 = scmp.lt.s32.totalorder %s253_s16, 3 }
   0x6   : > { %p139_p2 = pnand %p234_p0, %p138_p1 }
   0x7   : > { %p160_p3 = scmp.lt.s32.totalorder (!%p139_p2), %s230_s17, 1  ;;  %s168_s18 = sld [smem:[#allocation2]] (!%p139_p2)  ;;  %vm175_vm0 = vcmask (!%p139_p2), 7168  }
   0x8   : > { %142 = sbr.rel (%p139_p2) target bundleno = 24 (0x18), region = 32  ;;  %s169_s19 = sld [smem:[#allocation3]] (!%p139_p2) }
   0xd   : > { %v171_v1 = vstv (!%p139_p2), %s168_s18 }
   0xe   : > { %v173_v3 = vstv (!%p139_p2), %s169_s19 }
   0xf   : > { %s292_s17 = smov (!%p160_p3, %s230_s17), 1 }
  0x10   : > { %s235_s20 = sshll.u32 %s292_s17, 3 }
  0x11   : > { %s163_s22 = scalar_lea.vmem %s289_s2, %s235_s20  ;;  %s167_s24 = scalar_lea.vmem %s290_s3, %s235_s20 }
  0x12   : > { %v170_v0 = vld [vmem:[%s163_s22] sm:$0xff] }
  0x13   : > { %v172_v2 = vmul.f32 %v171_v1, %v170_v0 }
  0x15   : > { %v174_v4 = vadd.f32 %v173_v3, %v172_v2 }
  0x17   : > { %176 = vst.msk [vmem:[%s167_s24] sm:$0xff] %vm175_vm0, %v174_v4 }
  0x18 PF: > { %s15_s16 = sadd.s32 1, %s253_s16  }
  0x19   : > { %p12_p4 = scmp.ge.s32.totalorder %s15_s16, 4  }
  0x1b   :  { %14 = sbr.rel (!%p12_p4) target bundleno = 3 (0x3), region = 62 }

</bundles_post_ra>
